<compile_context>
chip_gen: v5e
topology: v5e:2x2
jax: 0.10.0
libtpu: 0.0.40
codegen_flags: <defaults>
</compile_context>

<pallas_src>
import jax
import jax.numpy as jnp
from jax.experimental import pallas as pl
from jax.experimental.pallas import tpu as pltpu

LANE = 128     # TPU vreg lane width; pad hidden dims to this
MAX_TB = 8192  # batch-tile cap: double-buffered x/out + intermediates stay well
               # under the 32 MiB scoped-VMEM default on every generation


def qnetwork_kernel(x_ref, w1_ref, b1_ref, w2_ref, b2_ref, w3_ref, b3_ref, o_ref):
    """One batch tile of the 3-layer MLP."""
    x = x_ref[...]  # f32; fc1 kept in f32 (tiny contraction dim)

    # fc1 + relu (f32 MXU, f32 accumulate)
    h1 = jnp.dot(x, w1_ref[...], preferred_element_type=jnp.float32) + b1_ref[...]
    h1 = jnp.maximum(h1, 0.0).astype(jnp.bfloat16)

    # fc2 + relu (bf16 operands, f32 accumulate/bias)
    h2 = jnp.dot(h1, w2_ref[...], preferred_element_type=jnp.float32) + b2_ref[...]
    h2 = jnp.maximum(h2, 0.0).astype(jnp.bfloat16)

    # fc3 (no activation)
    out = jnp.dot(h2, w3_ref[...], preferred_element_type=jnp.float32) + b3_ref[...]

    # Narrow store: only the real action lanes go to HBM; padded lanes (exact
    # zeros from zero-padded w3/b3) are dropped here instead of in a wrapper slice.
    o_ref[...] = out[:, : o_ref.shape[-1]]


def init_params(key, state_size, action_size, fc1=64, fc2=64):
    """PyTorch nn.Linear-style init (U[-1/sqrt(fan_in), +1/sqrt(fan_in)]), f32."""
    ks = jax.random.split(key, 6)

    def linear(kw, kb, fan_in, fan_out):
        bound = 1.0 / float(jnp.sqrt(jnp.float32(fan_in)))
        w = jax.random.uniform(kw, (fan_in, fan_out), jnp.float32, -bound, bound)
        b = jax.random.uniform(kb, (1, fan_out), jnp.float32, -bound, bound)
        return w, b

    w1, b1 = linear(ks[0], ks[1], state_size, fc1)
    w2, b2 = linear(ks[2], ks[3], fc1, fc2)
    w3, b3 = linear(ks[4], ks[5], fc2, action_size)
    # TODO(synk): fc4 is defined in the PyTorch __init__ but never used in forward(); omitted.
    return {"w1": w1, "b1": b1, "w2": w2, "b2": b2, "w3": w3, "b3": b3}


def _pad2d(a, rows, cols, dtype):
    out = jnp.zeros((rows, cols), dtype)
    return out.at[: a.shape[0], : a.shape[1]].set(a.astype(dtype))


def _round_up(n, m):
    return ((n + m - 1) // m) * m


def prepare_padded_params(params):
    """Zero-pad hidden dims to 128 lanes (done once). fc1 stays f32; fc2/fc3 -> bf16."""
    S = params["w1"].shape[0]
    H1 = _round_up(params["w1"].shape[1], LANE)
    H2 = _round_up(params["w2"].shape[1], LANE)
    AP = _round_up(params["w3"].shape[1], LANE)
    return {
        "w1": _pad2d(params["w1"], S, H1, jnp.float32),
        "b1": _pad2d(params["b1"], 1, H1, jnp.float32),
        "w2": _pad2d(params["w2"], H1, H2, jnp.bfloat16),
        "b2": _pad2d(params["b2"], 1, H2, jnp.float32),
        "w3": _pad2d(params["w3"], H2, AP, jnp.bfloat16),
        "b3": _pad2d(params["b3"], 1, AP, jnp.float32),
        "action_size": params["w3"].shape[1],
    }


def _choose_batch_tile(B, max_tb=MAX_TB):
    """Batch tile: whole batch if small, else an even number of steps >= 2
    (balanced across v7x's two TensorCores) with tiles a multiple of 8, <= max_tb."""
    if B <= 1024:
        return B
    n_pairs = -(-B // (2 * max_tb))          # ceil(B / (2*max_tb))
    tb = -(-B // (2 * n_pairs))              # ceil(B / (2*n_pairs))
    return min(_round_up(tb, 8), max_tb)


def qnetwork_forward(x, pp):
    """x: (B, state_size) f32. pp: output of prepare_padded_params. Returns (B, action_size) f32."""
    w1, b1, w2, b2, w3, b3 = pp["w1"], pp["b1"], pp["w2"], pp["b2"], pp["w3"], pp["b3"]
    A = pp["action_size"]
    B, S = x.shape
    H1, H2, AP = w1.shape[1], w2.shape[1], w3.shape[1]

    TB = _choose_batch_tile(B)
    grid = (pl.cdiv(B, TB),)

    pinned = lambda shape: pl.BlockSpec(shape, lambda i: (0, 0))  # weights VMEM-resident

    flops = 2 * B * (S * H1 + H1 * H2 + H2 * AP)
    bytes_accessed = int(
        x.size * x.dtype.itemsize
        + sum(int(a.size) * a.dtype.itemsize for a in (w1, b1, w2, b2, w3, b3))
        + B * A * 4
    )

    return pl.pallas_call(
        qnetwork_kernel,
        out_shape=jax.ShapeDtypeStruct((B, A), jnp.float32),
        grid=grid,
        in_specs=[
            pl.BlockSpec((TB, S), lambda i: (i, 0)),
            pinned(w1.shape), pinned(b1.shape),
            pinned(w2.shape), pinned(b2.shape),
            pinned(w3.shape), pinned(b3.shape),
        ],
        out_specs=pl.BlockSpec((TB, A), lambda i: (i, 0)),
        compiler_params=pltpu.CompilerParams(
            dimension_semantics=("parallel",),  # shard batch tiles across TCs (v7x)
        ),
        cost_estimate=pl.CostEstimate(
            flops=flops, transcendentals=0, bytes_accessed=bytes_accessed
        ),
    )(x, w1, b1, w2, b2, w3, b3)


def reference_forward_f32(x, p):
    h1 = jnp.maximum(x @ p["w1"] + p["b1"], 0.0)
    h2 = jnp.maximum(h1 @ p["w2"] + p["b2"], 0.0)
    return h2 @ p["w3"] + p["b3"]


def reference_forward_mixed_emulated(x, p):
    """Same math as the kernel: fc1 in f32, fc2/fc3 with bf16 operands, f32 accum/bias."""
    c = lambda a: a.astype(jnp.bfloat16).astype(jnp.float32)
    h1 = jnp.maximum(jnp.dot(x, p["w1"]) + p["b1"], 0.0)
    h2 = jnp.maximum(jnp.dot(c(h1), c(p["w2"])) + p["b2"], 0.0)
    return jnp.dot(c(h2), c(p["w3"])) + p["b3"]


if __name__ == "__main__":
    key = jax.random.PRNGKey(0)
    k_param, k_x1, k_x2 = jax.random.split(key, 3)

    state_size, action_size = 8, 4
    params = init_params(k_param, state_size, action_size)
    padded = prepare_padded_params(params)

    # Small batch: single grid step (block shapes equal full array dims).
    x_small = jax.random.normal(k_x1, (2, state_size), jnp.float32)
    out_small = jax.block_until_ready(qnetwork_forward(x_small, padded))
    assert out_small.shape == (2, action_size)
    assert jnp.allclose(out_small, reference_forward_mixed_emulated(x_small, params),
                        atol=1e-2, rtol=1e-2), "small-batch mismatch vs emulated reference"
    assert jnp.allclose(out_small, reference_forward_f32(x_small, params),
                        atol=5e-2, rtol=5e-2), "small-batch mismatch vs f32 reference"

    # Larger batch: even 2-step grid with a partial last tile (TB=1032, B=2056).
    x_big = jax.random.normal(k_x2, (2056, state_size), jnp.float32)
    out_big = jax.block_until_ready(qnetwork_forward(x_big, padded))
    assert out_big.shape == (2056, action_size)
    assert jnp.allclose(out_big, reference_forward_mixed_emulated(x_big, params),
                        atol=1e-2, rtol=1e-2), "big-batch mismatch vs emulated reference"
    assert jnp.allclose(out_big, reference_forward_f32(x_big, params),
                        atol=5e-2, rtol=5e-2), "big-batch mismatch vs f32 reference"

    print("KERNEL_OK")
</pallas_src>

<mosaic_0001>
module attributes {stable_mosaic.version = 11 : i64} {
  func.func @qnetwork_kernel(%arg0: i32, %arg1: memref<2x8xf32, #tpu.memory_space<vmem>>, %arg2: memref<8x128xf32, #tpu.memory_space<vmem>>, %arg3: memref<1x128xf32, #tpu.memory_space<vmem>>, %arg4: memref<128x128xbf16, #tpu.memory_space<vmem>>, %arg5: memref<1x128xf32, #tpu.memory_space<vmem>>, %arg6: memref<128x128xbf16, #tpu.memory_space<vmem>>, %arg7: memref<1x128xf32, #tpu.memory_space<vmem>>, %arg8: memref<2x4xf32, #tpu.memory_space<vmem>>) attributes {dimension_semantics = [#tpu.dimension_semantics<parallel>], iteration_bounds = array<i64: 1>, scalar_prefetch = 0 : i64, scratch_operands = 0 : i64, tpu.core_type = #tpu.core_type<tc>, window_params = [{transform_indices = @transform_0, window_bounds = array<i64: 2, 8>}, {pipeline_mode = #tpu.pipeline_mode<synchronous>, transform_indices = @transform_1, window_bounds = array<i64: 8, 128>}, {pipeline_mode = #tpu.pipeline_mode<synchronous>, transform_indices = @transform_2, window_bounds = array<i64: 1, 128>}, {pipeline_mode = #tpu.pipeline_mode<synchronous>, transform_indices = @transform_3, window_bounds = array<i64: 128, 128>}, {pipeline_mode = #tpu.pipeline_mode<synchronous>, transform_indices = @transform_4, window_bounds = array<i64: 1, 128>}, {pipeline_mode = #tpu.pipeline_mode<synchronous>, transform_indices = @transform_5, window_bounds = array<i64: 128, 128>}, {pipeline_mode = #tpu.pipeline_mode<synchronous>, transform_indices = @transform_6, window_bounds = array<i64: 1, 128>}, {transform_indices = @transform_7, window_bounds = array<i64: 2, 4>}]} {
    %c0 = arith.constant 0 : index
    %c0_0 = arith.constant 0 : index
    %0 = vector.load %arg1[%c0, %c0_0] : memref<2x8xf32, #tpu.memory_space<vmem>>, vector<2x8xf32>
    %c0_1 = arith.constant 0 : index
    %c0_2 = arith.constant 0 : index
    %1 = vector.load %arg2[%c0_1, %c0_2] : memref<8x128xf32, #tpu.memory_space<vmem>>, vector<8x128xf32>
    %cst = arith.constant dense<0.000000e+00> : vector<2x128xf32>
    %2 = tpu.matmul %0, %1, %cst {dimension_numbers = #tpu.dot_dimension_numbers<[1], [0], [0], [1], [0, 0, 1, 1], [], []>} : vector<2x8xf32>, vector<8x128xf32>, vector<2x128xf32> -> vector<2x128xf32>
    %c0_3 = arith.constant 0 : index
    %c0_4 = arith.constant 0 : index
    %3 = vector.load %arg3[%c0_3, %c0_4] : memref<1x128xf32, #tpu.memory_space<vmem>>, vector<1x128xf32>
    %4 = vector.broadcast %3 : vector<1x128xf32> to vector<2x128xf32>
    %5 = arith.addf %2, %4 : vector<2x128xf32>
    %cst_5 = arith.constant 0.000000e+00 : f32
    %6 = vector.broadcast %cst_5 : f32 to vector<2x128xf32>
    %7 = arith.maximumf %5, %6 : vector<2x128xf32>
    %8 = arith.truncf %7 : vector<2x128xf32> to vector<2x128xbf16>
    %c0_6 = arith.constant 0 : index
    %c0_7 = arith.constant 0 : index
    %9 = vector.load %arg4[%c0_6, %c0_7] : memref<128x128xbf16, #tpu.memory_space<vmem>>, vector<128x128xbf16>
    %cst_8 = arith.constant dense<0.000000e+00> : vector<2x128xf32>
    %10 = tpu.matmul %8, %9, %cst_8 {dimension_numbers = #tpu.dot_dimension_numbers<[1], [0], [0], [1], [0, 0, 1, 1], [], []>} : vector<2x128xbf16>, vector<128x128xbf16>, vector<2x128xf32> -> vector<2x128xf32>
    %c0_9 = arith.constant 0 : index
    %c0_10 = arith.constant 0 : index
    %11 = vector.load %arg5[%c0_9, %c0_10] : memref<1x128xf32, #tpu.memory_space<vmem>>, vector<1x128xf32>
    %12 = vector.broadcast %11 : vector<1x128xf32> to vector<2x128xf32>
    %13 = arith.addf %10, %12 : vector<2x128xf32>
    %cst_11 = arith.constant 0.000000e+00 : f32
    %14 = vector.broadcast %cst_11 : f32 to vector<2x128xf32>
    %15 = arith.maximumf %13, %14 : vector<2x128xf32>
    %16 = arith.truncf %15 : vector<2x128xf32> to vector<2x128xbf16>
    %c0_12 = arith.constant 0 : index
    %c0_13 = arith.constant 0 : index
    %17 = vector.load %arg6[%c0_12, %c0_13] : memref<128x128xbf16, #tpu.memory_space<vmem>>, vector<128x128xbf16>
    %cst_14 = arith.constant dense<0.000000e+00> : vector<2x128xf32>
    %18 = tpu.matmul %16, %17, %cst_14 {dimension_numbers = #tpu.dot_dimension_numbers<[1], [0], [0], [1], [0, 0, 1, 1], [], []>} : vector<2x128xbf16>, vector<128x128xbf16>, vector<2x128xf32> -> vector<2x128xf32>
    %c0_15 = arith.constant 0 : index
    %c0_16 = arith.constant 0 : index
    %19 = vector.load %arg7[%c0_15, %c0_16] : memref<1x128xf32, #tpu.memory_space<vmem>>, vector<1x128xf32>
    %20 = vector.broadcast %19 : vector<1x128xf32> to vector<2x128xf32>
    %21 = arith.addf %18, %20 : vector<2x128xf32>
    %22 = vector.extract_strided_slice %21 {offsets = [0, 0], sizes = [2, 4], strides = [1, 1]} : vector<2x128xf32> to vector<2x4xf32>
    %c0_17 = arith.constant 0 : index
    %c0_18 = arith.constant 0 : index
    %23 = vector.load %arg8[%c0_17, %c0_18] : memref<2x4xf32, #tpu.memory_space<vmem>>, vector<2x4xf32>
    tpu.vector_store %arg8[%c0_17, %c0_18], %22 {strides = array<i32>} : memref<2x4xf32, #tpu.memory_space<vmem>>, vector<2x4xf32>,
    return
  }
  func.func @transform_0(%arg0: i32) -> (i32, i32) {
    %c0_i32 = arith.constant 0 : i32
    %c0_i32_0 = arith.constant 0 : i32
    return %arg0, %c0_i32 : i32, i32
  }
  func.func @transform_1(%arg0: i32) -> (i32, i32) {
    %c0_i32 = arith.constant 0 : i32
    %c0_i32_0 = arith.constant 0 : i32
    %c0_i32_1 = arith.constant 0 : i32
    return %c0_i32, %c0_i32_0 : i32, i32
  }
  func.func @transform_2(%arg0: i32) -> (i32, i32) {
    %c0_i32 = arith.constant 0 : i32
    %c0_i32_0 = arith.constant 0 : i32
    %c0_i32_1 = arith.constant 0 : i32
    return %c0_i32, %c0_i32_0 : i32, i32
  }
  func.func @transform_3(%arg0: i32) -> (i32, i32) {
    %c0_i32 = arith.constant 0 : i32
    %c0_i32_0 = arith.constant 0 : i32
    %c0_i32_1 = arith.constant 0 : i32
    return %c0_i32, %c0_i32_0 : i32, i32
  }
  func.func @transform_4(%arg0: i32) -> (i32, i32) {
    %c0_i32 = arith.constant 0 : i32
    %c0_i32_0 = arith.constant 0 : i32
    %c0_i32_1 = arith.constant 0 : i32
    return %c0_i32, %c0_i32_0 : i32, i32
  }
  func.func @transform_5(%arg0: i32) -> (i32, i32) {
    %c0_i32 = arith.constant 0 : i32
    %c0_i32_0 = arith.constant 0 : i32
    %c0_i32_1 = arith.constant 0 : i32
    return %c0_i32, %c0_i32_0 : i32, i32
  }
  func.func @transform_6(%arg0: i32) -> (i32, i32) {
    %c0_i32 = arith.constant 0 : i32
    %c0_i32_0 = arith.constant 0 : i32
    %c0_i32_1 = arith.constant 0 : i32
    return %c0_i32, %c0_i32_0 : i32, i32
  }
  func.func @transform_7(%arg0: i32) -> (i32, i32) {
    %c0_i32 = arith.constant 0 : i32
    %c0_i32_0 = arith.constant 0 : i32
    return %arg0, %c0_i32 : i32, i32
  }
}

</mosaic_0001>

<bundles_post_ra>
// kernel: tpu_custom_call.1
= control target key start
LH: loop header
LB: loop body
LE: loop exit
PB: predicated region body
PF: predicated region fallthrough
CT: control target
= control target key end

     0   :  { %12 = vsyncpa [#allocation3], 0  ;;  %s593_s0 = inlined_call_operand.hbm [shape: f32[2,8], index: 0, kind: input, shape index: {}]   ;;  %s594_s1 = inlined_call_operand.hbm [shape: f32[8,128], index: 1, kind: input, shape index: {}]   ;;  %s595_s2 = inlined_call_operand.vmem [shape: f32[1,128], index: 2, kind: input, shape index: {}]   ;;  %s596_s3 = inlined_call_operand.hbm [shape: bf16[128,128], index: 3, kind: input, shape index: {}]   ;;  %s597_s4 = inlined_call_operand.vmem [shape: f32[1,128], index: 4, kind: input, shape index: {}]   ;;  %s598_s5 = inlined_call_operand.hbm [shape: bf16[128,128], index: 5, kind: input, shape index: {}]   ;;  %s599_s6 = inlined_call_operand.vmem [shape: f32[1,128], index: 6, kind: input, shape index: {}]   ;;  %s600_s7 = inlined_call_operand.hbm [shape: f32[2,4], index: 7, kind: output, shape index: {}]  }
   0x1   :  { %13 = vsyncpa [#allocation6], 0 }
   0x2   :  { %14 = vsyncpa [#allocation9], 0  ;;  %s32_s26 = sshll.u32 %s594_s1, 4  ;;  %s33_s26 = int_to_ptr.hbm [resolvable:$true] %s32_s26 }
   0x3   :  { %15 = vsyncpa [#allocation4], 0  ;;  %s522_s27 = smov [#allocation5]   ;;  %s21_s8 = sshll.u32 %s593_s0, 4  ;;  %s22_s8 = int_to_ptr.hbm [resolvable:$true] %s21_s8 }
   0x4   :  { %s34_s28 = sshll.u32 %s522_s27, 4  ;;  %s523_s9 = smov [#allocation2]   ;;  %s35_s28 = int_to_ptr.vmem [resolvable:$true] %s34_s28 }
   0x5   :  { %37 = dma.hbm_to_vmem [thread:$0]  %s33_s26, 128, %s35_s28, [#allocation6]  }
   0x6   :  { %s23_s10 = sshll.u32 %s523_s9, 4  ;;  %s44_s13 = sshll.u32 %s596_s3, 4  ;;  %s24_s10 = int_to_ptr.vmem [resolvable:$true] %s23_s10  ;;  %s45_s13 = int_to_ptr.hbm [resolvable:$true] %s44_s13 }
   0x7   :  { %26 = dma.hbm_to_vmem [thread:$0]  %s22_s8, 32, %s24_s10, [#allocation3]  }
   0x8   :  { %s524_s1 = smov [#allocation7]   ;;  %s59_s17 = sshll.u32 %s598_s5, 4  ;;  %s60_s17 = int_to_ptr.hbm [resolvable:$true] %s59_s17 }
   0x9   :  { %s46_s14 = sshll.u32 %s524_s1, 4  ;;  %s525_s18 = smov 64   ;;  %s47_s14 = int_to_ptr.vmem [resolvable:$true] %s46_s14 }
   0xa   :  { %s526_s0 = smov 4   ;;  %s527_s19 = smov [#allocation8]  }
   0xb   :  { %52 = dma.hbm_to_vmem [thread:$0]  %s45_s13, 1024, %s47_s14, [#allocation6], %s525_s18, %s525_s18, %s526_s0  }
   0xc   :  { %s61_s20 = sshll.u32 %s527_s19, 4  ;;  %s62_s20 = int_to_ptr.vmem [resolvable:$true] %s61_s20 }
   0xd   :  { %67 = dma.hbm_to_vmem [thread:$0]  %s60_s17, 1024, %s62_s20, [#allocation9], %s525_s18, %s525_s18, %s526_s0  }
   0xe   :  { %514 = dma.done.wait [#allocation3], 32  }
   0xf   :  { %515 = vsyncadd [#allocation3], 4294967264 }
  0x10   :  { %516 = dma.done.wait [#allocation6], 1152  }
  0x11   :  { %517 = vsyncadd [#allocation6], 4294966144 }
  0x12   :  { %518 = dma.done.wait [#allocation9], 1024  }
  0x13   :  { %519 = vsyncadd [#allocation9], 4294966272  ;;  %vm92_vm0 = vcmask 64512   ;;  %v87_v0 = vld [vmem:[#allocation5] sm:$0xff]  ;;  %v86_v1 = vld [vmem:[#allocation2] sm:$0x3] }
  0x14   :  { %v375_v2 = vld [vmem:[#allocation7 + $0x38] sm:$0xff]  ;;  %111 = vmatpush.msra.mxu0 %v87_v0  ;;  %v374_v3 = vld [vmem:[#allocation7 + $0x30] sm:$0xff]  ;;  %v373_v4 = vld [vmem:[#allocation7 + $0x28] sm:$0xff]  ;;  %s528_s24 = smov [#allocation10]   ;;  %s291_s28 = sshll.u32 %s600_s7, 4  ;;  %vm282_vm1 = vcmask 25600   ;;  %s292_s28 = int_to_ptr.hbm [resolvable:$true] %s291_s28 }
  0x15   :  { %303 = vmatmul.msk.f32.vlgmr.msra.gmra.mxu0 %vm92_vm0, %v86_v1  ;;  %186 = vmatpush.bf16.msra.mxu1 %v375_v2  ;;  %v372_v5 = vld [vmem:[#allocation7 + $0x20] sm:$0xff]  ;;  %v371_v6 = vld [vmem:[#allocation7 + $0x18] sm:$0xff]  ;;  %v370_v7 = vld [vmem:[#allocation7 + $0x10] sm:$0xff]  ;;  %s289_s25 = sshll.u32 %s528_s24, 4  ;;  %s290_s25 = int_to_ptr.vmem [resolvable:$true] %s289_s25 }
  0x16   :  { %v369_v8 = vld [vmem:[#allocation7 + $0x8] sm:$0xff]  ;;  %v368_v9 = vld [vmem:[#allocation7] sm:$0xff]  ;;  %v383_v10 = vld [vmem:[#allocation8 + $0x38] sm:$0xff] }
  0x17   :  { %269 = vmatpush.bf16.msra.mxu2 %v383_v10  ;;  %v382_v11 = vld [vmem:[#allocation8 + $0x30] sm:$0xff]  ;;  %v381_v12 = vld [vmem:[#allocation8 + $0x28] sm:$0xff]  ;;  %v380_v13 = vld [vmem:[#allocation8 + $0x20] sm:$0xff] }
  0x18   :  { %v379_v14 = vld [vmem:[#allocation8 + $0x18] sm:$0xff]  ;;  %v378_v15 = vld [vmem:[#allocation8 + $0x10] sm:$0xff]  ;;  %v377_v21 = vld [vmem:[#allocation8 + $0x8] sm:$0xff] }
  0x19   :  { %187 = vmatpush.bf16.msra.mxu1 %v374_v3  ;;  %v391_v16 = vld [vmem:[%s595_s2] ss:$0 sm:$0xff]  ;;  %v376_v22 = vld [vmem:[#allocation8] sm:$0xff] }
  0x1a   :  { %v392_v23 = vld [vmem:[%s597_s4] ss:$0 sm:$0xff] }
  0x1b   :  { %270 = vmatpush.bf16.msra.mxu2 %v382_v11  ;;  %v393_v29 = vld [vmem:[%s599_s6] ss:$0 sm:$0xff] }
  0x1d   :  { %188 = vmatpush.bf16.msra.mxu1 %v373_v4 }
  0x1f   :  { %271 = vmatpush.bf16.msra.mxu2 %v381_v12 }
  0x21   :  { %189 = vmatpush.bf16.msra.mxu1 %v372_v5 }
  0x23   :  { %272 = vmatpush.bf16.msra.mxu2 %v380_v13 }
  0x25   :  { %190 = vmatpush.bf16.msra.mxu1 %v371_v6 }
  0x27   :  { %273 = vmatpush.bf16.msra.mxu2 %v379_v14 }
  0x29   :  { %191 = vmatpush.bf16.msra.mxu1 %v370_v7 }
  0x2b   :  { %274 = vmatpush.bf16.msra.mxu2 %v378_v15 }
  0x2d   :  { %192 = vmatpush.bf16.msra.mxu1 %v369_v8 }
  0x2f   :  { %275 = vmatpush.bf16.msra.mxu2 %v377_v21 }
  0x31   :  { %193 = vmatpush.bf16.msra.mxu1 %v368_v9 }
  0x33   :  { %276 = vmatpush.bf16.msra.mxu2 %v376_v22 }
  0x92   :  { %v113_v17 = vpop.f32.mrf.mxu0 }
  0x93   :  { %v114_v18 = vadd.f32 %v391_v16, %v113_v17 }
  0x95   :  { %v116_v19 = vmax.f32 %v114_v18, 0.0 }
  0x97   :  { %v117_v20 = vpack.c.bf16 %v116_v19, %v116_v19 }
  0x99   :  { %194 = vmatmul.bf16.vlgmr.msra.gmra.mxu1 %v117_v20 }
 0x116   :  { %v195_v24 = vpop.f32.mrf.mxu1 }
 0x117   :  { %v196_v25 = vadd.f32 %v392_v23, %v195_v24 }
 0x119   :  { %v199_v26 = vmax.f32 %v196_v25, 0.0 }
 0x11b   :  { %v200_v27 = vpack.c.bf16 %v199_v26, %v199_v26 }
 0x11d   :  { %277 = vmatmul.bf16.vlgmr.msra.gmra.mxu2 %v200_v27 }
 0x11e   :  { %v197_v28 = vpop.f32.mrf.mxu1 }
 0x1a0   :  { %v278_v30 = vpop.f32.mrf.mxu2 }
 0x1a1   :  { %v279_v31 = vadd.f32 %v393_v29, %v278_v30 }
 0x1a3   :  { %283 = vst.msk [vmem:[#allocation10] sm:$0x3] %vm282_vm1, %v279_v31 }
 0x1a4   :  { %294 = dma.vmem_to_hbm [thread:$0]  %s290_s25, 32, %s292_s28, [#allocation4]  }
 0x1a8   :  { %v280_v32 = vpop.f32.mrf.mxu2 }
 0x1a9   :  { %520 = dma.done.wait [#allocation4], 32  }
 0x1aa   :  { %521 = vsyncadd [#allocation4], 4294967264 }
 0x1ab   :  { %299 = vsyncpa [#allocation3], 1 }
 0x1ac   :  { %300 = vsyncpa [#allocation6], 1 }
 0x1ad   :  { %301 = vsyncpa [#allocation9], 1 }
 0x1ae   :  { %302 = vsyncpa [#allocation4], 1 }

</bundles_post_ra>
